<compile_context>
chip_gen: v6e
topology: v6e:2x2x1
jax: 0.10.0
libtpu: 0.0.40
codegen_flags: <defaults>
</compile_context>

<pallas_src>
import functools

import jax
import jax.numpy as jnp
from jax.experimental import pallas as pl
from jax.experimental.pallas import tpu as pltpu


def _round_up(x, m):
    return (x + m - 1) // m * m


def _double_conv_kernel(x_ref, w1_ref, b1_ref, w2_ref, b2_ref, m_ref,
                        o_ref, y1_ref, col1_ref, col2_ref, *, H, W, Wp, Sp, G):
    """Fused conv3x3+IN+ReLU (x2) on the guard-padded flattened spatial domain.

    x_ref   : (C_in, Se)  bf16   guard-padded, zero-halo, flattened input
    w*_ref  : (C_out, 9*C_prev) bf16  conv weights, contraction order (ky, kx, c)
    b*_ref  : (C_out, 1)  f32    biases
    m_ref   : (1, Sp)     f32    interior mask (1 inside image, 0 halo/lane pad)
    o_ref   : (C_out, Sp) f32    output on the padded domain
    y1_ref  : (C_out, Se) bf16   VMEM scratch: conv1 activation (guard-padded)
    col*_ref: (9*C_prev, Sp) bf16 VMEM staging buffers (stacked tap slices)
    """
    inv_S = 1.0 / float(H * W)
    interior = m_ref[...]                                   # (1, Sp) f32

    # Zero ONLY the two guard strips of the conv1-activation scratch (its Sp
    # interior is fully overwritten below with an exact-zero halo).  Done every
    # step -- cheap (2 x (C_out, G)) and robust when the "parallel" batch axis
    # is sharded across TensorCores (a pid==0-only init would be skipped there).
    c_out = y1_ref.shape[0]
    guard_z = jnp.zeros((c_out, G), y1_ref.dtype)
    y1_ref[:, :G] = guard_z
    y1_ref[:, G + Sp:] = guard_z

    tap_offsets = tuple((ky - 1) * Wp + (kx - 1) for ky in range(3) for kx in range(3))

    def conv_in_relu(src_ref, col_ref, w_ref, b_ref, mask_output):
        c_prev = col_ref.shape[0] // 9
        # Stack the 9 tap slices along the contraction axis so the whole 3x3
        # conv is ONE MXU matmul with the accumulation inside the MXU.
        for t, d in enumerate(tap_offsets):
            col_ref[t * c_prev:(t + 1) * c_prev, :] = src_ref[:, G + d:G + d + Sp]
        acc = jnp.dot(w_ref[...], col_ref[...],
                      preferred_element_type=jnp.float32)   # (C_out, Sp) f32
        acc = acc + b_ref[...]                              # bias (lane broadcast)
        am = acc * interior                                 # exclude halo from stats (f32)
        s1 = jnp.sum(am, axis=1, keepdims=True)             # single-pass IN statistics
        s2 = jnp.sum(am * am, axis=1, keepdims=True)
        mean = s1 * inv_S
        var = s2 * inv_S - mean * mean                      # biased variance (PyTorch IN)
        y = jnp.maximum((acc - mean) * jax.lax.rsqrt(var + 1e-5), 0.0)
        # Only conv1 needs an exact-zero halo (it feeds conv2's pad=1 reads);
        # the final halo / lane padding is stripped by the XLA slice outside.
        return y * interior if mask_output else y

    y1 = conv_in_relu(x_ref, col1_ref, w1_ref, b1_ref, mask_output=True)
    y1_ref[:, G:G + Sp] = y1.astype(y1_ref.dtype)           # conv1 act stays in VMEM (bf16)
    y2 = conv_in_relu(y1_ref, col2_ref, w2_ref, b2_ref, mask_output=False)
    o_ref[...] = y2.astype(o_ref.dtype)


@jax.jit
def double_conv_forward(x, w1, b1, w2, b2):
    N, C_in, H, W = x.shape
    C_out = w1.shape[0]
    cdt = jnp.bfloat16                      # MXU operand dtype; stats/epilogue stay f32

    C_in_p = _round_up(C_in, 8)             # channel padding -> sublane-aligned staging
    C_out_p = _round_up(C_out, 8)
    Hp, Wp = H + 2, W + 2
    Sp_real = Hp * Wp
    Sp = _round_up(Sp_real, 128)            # lane-dense padded flattened spatial axis
    G = _round_up(Wp + 1, 128)              # guard (tap slices statically in bounds),
                                            # 128-aligned -> unmasked y1 interior store
    Se = Sp + 2 * G

    # --- cheap XLA glue: zero halo (conv pad=1) -> flatten -> lane/guard pad, bf16 cast
    xe = jnp.pad(x, ((0, 0), (0, C_in_p - C_in), (1, 1), (1, 1)))
    xe = xe.reshape(N, C_in_p, Sp_real)
    xe = jnp.pad(xe, ((0, 0), (0, 0), (G, Sp - Sp_real + G))).astype(cdt)

    # --- weights as (C_out, 9*C_prev), contraction order (ky, kx, c) to match staging
    w1p = jnp.pad(w1, ((0, C_out_p - C_out), (0, C_in_p - C_in), (0, 0), (0, 0)))
    w2p = jnp.pad(w2, ((0, C_out_p - C_out), (0, C_out_p - C_out), (0, 0), (0, 0)))
    w1k = jnp.transpose(w1p, (0, 2, 3, 1)).reshape(C_out_p, 9 * C_in_p).astype(cdt)
    w2k = jnp.transpose(w2p, (0, 2, 3, 1)).reshape(C_out_p, 9 * C_out_p).astype(cdt)
    b1k = jnp.pad(b1, (0, C_out_p - C_out)).reshape(C_out_p, 1).astype(jnp.float32)
    b2k = jnp.pad(b2, (0, C_out_p - C_out)).reshape(C_out_p, 1).astype(jnp.float32)

    # --- f32 interior mask over the padded flattened domain (no in-kernel div/mod)
    pp = jnp.arange(Sp, dtype=jnp.int32)
    rr, cc = pp // Wp, pp % Wp
    interior = ((pp < Sp_real) & (rr >= 1) & (rr <= H) & (cc >= 1) & (cc <= W))
    interior = interior.astype(jnp.float32).reshape(1, Sp)

    kernel = functools.partial(_double_conv_kernel, H=H, W=W, Wp=Wp, Sp=Sp, G=G)

    # VMEM budget: double-buffered blocks + persistent scratch (+ headroom)
    blocks = (C_in_p * Se + C_out_p * 9 * C_in_p + C_out_p * 9 * C_out_p) * 2 \
             + (2 * C_out_p + Sp) * 4 + C_out_p * Sp * 4
    scratch = (C_out_p * Se + 9 * C_in_p * Sp + 9 * C_out_p * Sp) * 2
    vmem_limit = int(min(64 << 20, max(16 << 20, 2 * blocks + scratch + (2 << 20))))

    flops = int(2 * N * Sp * 9 * (C_in_p * C_out_p + C_out_p * C_out_p))
    bytes_accessed = int(xe.size * 2 + N * C_out_p * Sp * 4
                         + (w1k.size + w2k.size) * 2
                         + (b1k.size + b2k.size + interior.size) * 4)

    out = pl.pallas_call(
        kernel,
        out_shape=jax.ShapeDtypeStruct((N, C_out_p, Sp), jnp.float32),
        grid=(N,),
        in_specs=[
            pl.BlockSpec((None, C_in_p, Se), lambda n: (n, 0, 0)),
            pl.BlockSpec((C_out_p, 9 * C_in_p), lambda n: (0, 0)),
            pl.BlockSpec((C_out_p, 1), lambda n: (0, 0)),
            pl.BlockSpec((C_out_p, 9 * C_out_p), lambda n: (0, 0)),
            pl.BlockSpec((C_out_p, 1), lambda n: (0, 0)),
            pl.BlockSpec((1, Sp), lambda n: (0, 0)),
        ],
        out_specs=pl.BlockSpec((None, C_out_p, Sp), lambda n: (n, 0, 0)),
        scratch_shapes=[
            pltpu.VMEM((C_out_p, Se), cdt),        # conv1 activation (guard-padded)
            pltpu.VMEM((9 * C_in_p, Sp), cdt),     # conv1 tap staging
            pltpu.VMEM((9 * C_out_p, Sp), cdt),    # conv2 tap staging
        ],
        compiler_params=pltpu.CompilerParams(
            dimension_semantics=("parallel",),
            vmem_limit_bytes=vmem_limit),
        cost_estimate=pl.CostEstimate(flops=flops,
                                      transcendentals=int(2 * N * C_out_p),
                                      bytes_accessed=bytes_accessed),
    )(xe, w1k, b1k, w2k, b2k, interior)

    # glue: drop channel/lane padding, strip the zero halo -> NCHW
    out = out[:, :C_out, :Sp_real].reshape(N, C_out, Hp, Wp)
    return out[:, :, 1:H + 1, 1:W + 1]


# ---------------------------------------------------------------------------
# Pure-JAX f32 reference (correctness check only)
# ---------------------------------------------------------------------------
def _ref_forward(x, w1, b1, w2, b2):
    def block(z, w, b):
        y = jax.lax.conv_general_dilated(
            z, w, (1, 1), ((1, 1), (1, 1)),
            dimension_numbers=("NCHW", "OIHW", "NCHW"),
        ) + b[None, :, None, None]
        m = y.mean(axis=(2, 3), keepdims=True)
        v = ((y - m) ** 2).mean(axis=(2, 3), keepdims=True)
        y = (y - m) * jax.lax.rsqrt(v + 1e-5)
        return jnp.maximum(y, 0.0)

    return block(block(x, w1, b1), w2, b2)


if __name__ == "__main__":
    N, C_in, C_out, H, W = 2, 4, 8, 16, 16
    key = jax.random.PRNGKey(0)
    kx, k1, k2, k3, k4 = jax.random.split(key, 5)

    x = jax.random.normal(kx, (N, C_in, H, W), jnp.float32)

    # deterministic parameter init (PyTorch-like uniform(+-1/sqrt(fan_in)))
    fan1 = C_in * 9
    w1 = jax.random.uniform(k1, (C_out, C_in, 3, 3), jnp.float32, -1.0, 1.0) / jnp.sqrt(fan1)
    b1 = jax.random.uniform(k2, (C_out,), jnp.float32, -1.0, 1.0) / jnp.sqrt(fan1)
    fan2 = C_out * 9
    w2 = jax.random.uniform(k3, (C_out, C_out, 3, 3), jnp.float32, -1.0, 1.0) / jnp.sqrt(fan2)
    b2 = jax.random.uniform(k4, (C_out,), jnp.float32, -1.0, 1.0) / jnp.sqrt(fan2)

    out = jax.block_until_ready(double_conv_forward(x, w1, b1, w2, b2))

    assert out.shape == (N, C_out, H, W), out.shape
    ref = _ref_forward(x, w1, b1, w2, b2)
    # bf16 MXU operands with f32 accumulation / f32 epilogue -> bf16-level tolerance
    max_err = float(jnp.max(jnp.abs(out - ref)))
    assert jnp.allclose(out, ref, atol=3e-2, rtol=3e-2), f"max abs err {max_err}"

    print("KERNEL_OK")
</pallas_src>

<mosaic_0001>
module attributes {stable_mosaic.version = 11 : i64} {
  func.func @_double_conv_kernel(%arg0: i32, %arg1: memref<1x8x640xbf16, #tpu.memory_space<vmem>>, %arg2: memref<8x72xbf16, #tpu.memory_space<vmem>>, %arg3: memref<8x1xf32, #tpu.memory_space<vmem>>, %arg4: memref<8x72xbf16, #tpu.memory_space<vmem>>, %arg5: memref<8x1xf32, #tpu.memory_space<vmem>>, %arg6: memref<1x384xf32, #tpu.memory_space<vmem>>, %arg7: memref<1x8x384xf32, #tpu.memory_space<vmem>>, %arg8: memref<8x640xbf16, #tpu.memory_space<vmem>>, %arg9: memref<72x384xbf16, #tpu.memory_space<vmem>>, %arg10: memref<72x384xbf16, #tpu.memory_space<vmem>>) attributes {dimension_semantics = [#tpu.dimension_semantics<parallel>], iteration_bounds = array<i64: 2>, scalar_prefetch = 0 : i64, scratch_operands = 3 : i64, tpu.core_type = #tpu.core_type<tc>, window_params = [{transform_indices = @transform_0, window_bounds = array<i64: 1, 8, 640>}, {pipeline_mode = #tpu.pipeline_mode<synchronous>, transform_indices = @transform_1, window_bounds = array<i64: 8, 72>}, {pipeline_mode = #tpu.pipeline_mode<synchronous>, transform_indices = @transform_2, window_bounds = array<i64: 8, 1>}, {pipeline_mode = #tpu.pipeline_mode<synchronous>, transform_indices = @transform_3, window_bounds = array<i64: 8, 72>}, {pipeline_mode = #tpu.pipeline_mode<synchronous>, transform_indices = @transform_4, window_bounds = array<i64: 8, 1>}, {pipeline_mode = #tpu.pipeline_mode<synchronous>, transform_indices = @transform_5, window_bounds = array<i64: 1, 384>}, {transform_indices = @transform_6, window_bounds = array<i64: 1, 8, 384>}]} {
    %c0 = arith.constant 0 : index
    %c0_0 = arith.constant 0 : index
    %0 = vector.load %arg6[%c0, %c0_0] : memref<1x384xf32, #tpu.memory_space<vmem>>, vector<1x384xf32>
    %cst = arith.constant 0.000000e+00 : bf16
    %1 = vector.broadcast %cst : bf16 to vector<8x128xbf16>
    %c0_1 = arith.constant 0 : index
    %c0_2 = arith.constant 0 : index
    %2 = vector.load %arg8[%c0_1, %c0_2] : memref<8x640xbf16, #tpu.memory_space<vmem>>, vector<8x128xbf16>
    tpu.vector_store %arg8[%c0_1, %c0_2], %1 {strides = array<i32>} : memref<8x640xbf16, #tpu.memory_space<vmem>>, vector<8x128xbf16>,
    %c0_3 = arith.constant 0 : index
    %c512 = arith.constant 512 : index
    %3 = vector.load %arg8[%c0_3, %c512] : memref<8x640xbf16, #tpu.memory_space<vmem>>, vector<8x128xbf16>
    tpu.vector_store %arg8[%c0_3, %c512], %1 {strides = array<i32>} : memref<8x640xbf16, #tpu.memory_space<vmem>>, vector<8x128xbf16>,
    %c0_4 = arith.constant 0 : index
    %c0_5 = arith.constant 0 : index
    %c109 = arith.constant 109 : index
    %4 = vector.load %arg1[%c0_4, %c0_5, %c109] : memref<1x8x640xbf16, #tpu.memory_space<vmem>>, vector<1x8x384xbf16>
    %5 = vector.shape_cast %4 : vector<1x8x384xbf16> to vector<8x384xbf16>
    %c0_6 = arith.constant 0 : index
    %c0_7 = arith.constant 0 : index
    %6 = vector.load %arg9[%c0_6, %c0_7] : memref<72x384xbf16, #tpu.memory_space<vmem>>, vector<8x384xbf16>
    tpu.vector_store %arg9[%c0_6, %c0_7], %5 {strides = array<i32>} : memref<72x384xbf16, #tpu.memory_space<vmem>>, vector<8x384xbf16>,
    %c0_8 = arith.constant 0 : index
    %c0_9 = arith.constant 0 : index
    %c110 = arith.constant 110 : index
    %7 = vector.load %arg1[%c0_8, %c0_9, %c110] : memref<1x8x640xbf16, #tpu.memory_space<vmem>>, vector<1x8x384xbf16>
    %8 = vector.shape_cast %7 : vector<1x8x384xbf16> to vector<8x384xbf16>
    %c8 = arith.constant 8 : index
    %c0_10 = arith.constant 0 : index
    %9 = vector.load %arg9[%c8, %c0_10] : memref<72x384xbf16, #tpu.memory_space<vmem>>, vector<8x384xbf16>
    tpu.vector_store %arg9[%c8, %c0_10], %8 {strides = array<i32>} : memref<72x384xbf16, #tpu.memory_space<vmem>>, vector<8x384xbf16>,
    %c0_11 = arith.constant 0 : index
    %c0_12 = arith.constant 0 : index
    %c111 = arith.constant 111 : index
    %10 = vector.load %arg1[%c0_11, %c0_12, %c111] : memref<1x8x640xbf16, #tpu.memory_space<vmem>>, vector<1x8x384xbf16>
    %11 = vector.shape_cast %10 : vector<1x8x384xbf16> to vector<8x384xbf16>
    %c16 = arith.constant 16 : index
    %c0_13 = arith.constant 0 : index
    %12 = vector.load %arg9[%c16, %c0_13] : memref<72x384xbf16, #tpu.memory_space<vmem>>, vector<8x384xbf16>
    tpu.vector_store %arg9[%c16, %c0_13], %11 {strides = array<i32>} : memref<72x384xbf16, #tpu.memory_space<vmem>>, vector<8x384xbf16>,
    %c0_14 = arith.constant 0 : index
    %c0_15 = arith.constant 0 : index
    %c127 = arith.constant 127 : index
    %13 = vector.load %arg1[%c0_14, %c0_15, %c127] : memref<1x8x640xbf16, #tpu.memory_space<vmem>>, vector<1x8x384xbf16>
    %14 = vector.shape_cast %13 : vector<1x8x384xbf16> to vector<8x384xbf16>
    %c24 = arith.constant 24 : index
    %c0_16 = arith.constant 0 : index
    %15 = vector.load %arg9[%c24, %c0_16] : memref<72x384xbf16, #tpu.memory_space<vmem>>, vector<8x384xbf16>
    tpu.vector_store %arg9[%c24, %c0_16], %14 {strides = array<i32>} : memref<72x384xbf16, #tpu.memory_space<vmem>>, vector<8x384xbf16>,
    %c0_17 = arith.constant 0 : index
    %c0_18 = arith.constant 0 : index
    %c128 = arith.constant 128 : index
    %16 = vector.load %arg1[%c0_17, %c0_18, %c128] : memref<1x8x640xbf16, #tpu.memory_space<vmem>>, vector<1x8x384xbf16>
    %17 = vector.shape_cast %16 : vector<1x8x384xbf16> to vector<8x384xbf16>
    %c32 = arith.constant 32 : index
    %c0_19 = arith.constant 0 : index
    %18 = vector.load %arg9[%c32, %c0_19] : memref<72x384xbf16, #tpu.memory_space<vmem>>, vector<8x384xbf16>
    tpu.vector_store %arg9[%c32, %c0_19], %17 {strides = array<i32>} : memref<72x384xbf16, #tpu.memory_space<vmem>>, vector<8x384xbf16>,
    %c0_20 = arith.constant 0 : index
    %c0_21 = arith.constant 0 : index
    %c129 = arith.constant 129 : index
    %19 = vector.load %arg1[%c0_20, %c0_21, %c129] : memref<1x8x640xbf16, #tpu.memory_space<vmem>>, vector<1x8x384xbf16>
    %20 = vector.shape_cast %19 : vector<1x8x384xbf16> to vector<8x384xbf16>
    %c40 = arith.constant 40 : index
    %c0_22 = arith.constant 0 : index
    %21 = vector.load %arg9[%c40, %c0_22] : memref<72x384xbf16, #tpu.memory_space<vmem>>, vector<8x384xbf16>
    tpu.vector_store %arg9[%c40, %c0_22], %20 {strides = array<i32>} : memref<72x384xbf16, #tpu.memory_space<vmem>>, vector<8x384xbf16>,
    %c0_23 = arith.constant 0 : index
    %c0_24 = arith.constant 0 : index
    %c145 = arith.constant 145 : index
    %22 = vector.load %arg1[%c0_23, %c0_24, %c145] : memref<1x8x640xbf16, #tpu.memory_space<vmem>>, vector<1x8x384xbf16>
    %23 = vector.shape_cast %22 : vector<1x8x384xbf16> to vector<8x384xbf16>
    %c48 = arith.constant 48 : index
    %c0_25 = arith.constant 0 : index
    %24 = vector.load %arg9[%c48, %c0_25] : memref<72x384xbf16, #tpu.memory_space<vmem>>, vector<8x384xbf16>
    tpu.vector_store %arg9[%c48, %c0_25], %23 {strides = array<i32>} : memref<72x384xbf16, #tpu.memory_space<vmem>>, vector<8x384xbf16>,
    %c0_26 = arith.constant 0 : index
    %c0_27 = arith.constant 0 : index
    %c146 = arith.constant 146 : index
    %25 = vector.load %arg1[%c0_26, %c0_27, %c146] : memref<1x8x640xbf16, #tpu.memory_space<vmem>>, vector<1x8x384xbf16>
    %26 = vector.shape_cast %25 : vector<1x8x384xbf16> to vector<8x384xbf16>
    %c56 = arith.constant 56 : index
    %c0_28 = arith.constant 0 : index
    %27 = vector.load %arg9[%c56, %c0_28] : memref<72x384xbf16, #tpu.memory_space<vmem>>, vector<8x384xbf16>
    tpu.vector_store %arg9[%c56, %c0_28], %26 {strides = array<i32>} : memref<72x384xbf16, #tpu.memory_space<vmem>>, vector<8x384xbf16>,
    %c0_29 = arith.constant 0 : index
    %c0_30 = arith.constant 0 : index
    %c147 = arith.constant 147 : index
    %28 = vector.load %arg1[%c0_29, %c0_30, %c147] : memref<1x8x640xbf16, #tpu.memory_space<vmem>>, vector<1x8x384xbf16>
    %29 = vector.shape_cast %28 : vector<1x8x384xbf16> to vector<8x384xbf16>
    %c64 = arith.constant 64 : index
    %c0_31 = arith.constant 0 : index
    %30 = vector.load %arg9[%c64, %c0_31] : memref<72x384xbf16, #tpu.memory_space<vmem>>, vector<8x384xbf16>
    tpu.vector_store %arg9[%c64, %c0_31], %29 {strides = array<i32>} : memref<72x384xbf16, #tpu.memory_space<vmem>>, vector<8x384xbf16>,
    %c0_32 = arith.constant 0 : index
    %c0_33 = arith.constant 0 : index
    %31 = vector.load %arg2[%c0_32, %c0_33] : memref<8x72xbf16, #tpu.memory_space<vmem>>, vector<8x72xbf16>
    %c0_34 = arith.constant 0 : index
    %c0_35 = arith.constant 0 : index
    %32 = vector.load %arg9[%c0_34, %c0_35] : memref<72x384xbf16, #tpu.memory_space<vmem>>, vector<72x384xbf16>
    %cst_36 = arith.constant dense<0.000000e+00> : vector<8x384xf32>
    %33 = tpu.matmul %31, %32, %cst_36 {dimension_numbers = #tpu.dot_dimension_numbers<[1], [0], [0], [1], [0, 0, 1, 1], [], []>} : vector<8x72xbf16>, vector<72x384xbf16>, vector<8x384xf32> -> vector<8x384xf32>
    %c0_37 = arith.constant 0 : index
    %c0_38 = arith.constant 0 : index
    %34 = vector.load %arg3[%c0_37, %c0_38] : memref<8x1xf32, #tpu.memory_space<vmem>>, vector<8x1xf32>
    %35 = vector.broadcast %34 : vector<8x1xf32> to vector<8x384xf32>
    %36 = arith.addf %33, %35 : vector<8x384xf32>
    %37 = vector.broadcast %0 : vector<1x384xf32> to vector<8x384xf32>
    %38 = arith.mulf %36, %37 : vector<8x384xf32>
    %cst_39 = arith.constant dense<0.000000e+00> : vector<8xf32>
    %39 = vector.multi_reduction <add>, %38, %cst_39 [1] : vector<8x384xf32> to vector<8xf32>
    %40 = vector.shape_cast %39 : vector<8xf32> to vector<8x1xf32>
    %41 = arith.mulf %38, %38 : vector<8x384xf32>
    %cst_40 = arith.constant dense<0.000000e+00> : vector<8xf32>
    %42 = vector.multi_reduction <add>, %41, %cst_40 [1] : vector<8x384xf32> to vector<8xf32>
    %43 = vector.shape_cast %42 : vector<8xf32> to vector<8x1xf32>
    %cst_41 = arith.constant 3.906250e-03 : f32
    %44 = vector.broadcast %cst_41 : f32 to vector<8x1xf32>
    %45 = arith.mulf %40, %44 : vector<8x1xf32>
    %cst_42 = arith.constant 3.906250e-03 : f32
    %46 = vector.broadcast %cst_42 : f32 to vector<8x1xf32>
    %47 = arith.mulf %43, %46 : vector<8x1xf32>
    %48 = arith.mulf %45, %45 : vector<8x1xf32>
    %49 = arith.subf %47, %48 : vector<8x1xf32>
    %50 = vector.broadcast %45 : vector<8x1xf32> to vector<8x384xf32>
    %51 = arith.subf %36, %50 : vector<8x384xf32>
    %cst_43 = arith.constant 9.99999974E-6 : f32
    %52 = vector.broadcast %cst_43 : f32 to vector<8x1xf32>
    %53 = arith.addf %49, %52 : vector<8x1xf32>
    %54 = math.rsqrt %53 : vector<8x1xf32>
    %55 = vector.broadcast %54 : vector<8x1xf32> to vector<8x384xf32>
    %56 = arith.mulf %51, %55 : vector<8x384xf32>
    %cst_44 = arith.constant 0.000000e+00 : f32
    %57 = vector.broadcast %cst_44 : f32 to vector<8x384xf32>
    %58 = arith.maximumf %56, %57 : vector<8x384xf32>
    %59 = vector.broadcast %0 : vector<1x384xf32> to vector<8x384xf32>
    %60 = arith.mulf %58, %59 : vector<8x384xf32>
    %61 = arith.truncf %60 : vector<8x384xf32> to vector<8x384xbf16>
    %c0_45 = arith.constant 0 : index
    %c128_46 = arith.constant 128 : index
    %62 = vector.load %arg8[%c0_45, %c128_46] : memref<8x640xbf16, #tpu.memory_space<vmem>>, vector<8x384xbf16>
    tpu.vector_store %arg8[%c0_45, %c128_46], %61 {strides = array<i32>} : memref<8x640xbf16, #tpu.memory_space<vmem>>, vector<8x384xbf16>,
    %c0_47 = arith.constant 0 : index
    %c109_48 = arith.constant 109 : index
    %63 = vector.load %arg8[%c0_47, %c109_48] : memref<8x640xbf16, #tpu.memory_space<vmem>>, vector<8x384xbf16>
    %c0_49 = arith.constant 0 : index
    %c0_50 = arith.constant 0 : index
    %64 = vector.load %arg10[%c0_49, %c0_50] : memref<72x384xbf16, #tpu.memory_space<vmem>>, vector<8x384xbf16>
    tpu.vector_store %arg10[%c0_49, %c0_50], %63 {strides = array<i32>} : memref<72x384xbf16, #tpu.memory_space<vmem>>, vector<8x384xbf16>,
    %c0_51 = arith.constant 0 : index
    %c110_52 = arith.constant 110 : index
    %65 = vector.load %arg8[%c0_51, %c110_52] : memref<8x640xbf16, #tpu.memory_space<vmem>>, vector<8x384xbf16>
    %c8_53 = arith.constant 8 : index
    %c0_54 = arith.constant 0 : index
    %66 = vector.load %arg10[%c8_53, %c0_54] : memref<72x384xbf16, #tpu.memory_space<vmem>>, vector<8x384xbf16>
    tpu.vector_store %arg10[%c8_53, %c0_54], %65 {strides = array<i32>} : memref<72x384xbf16, #tpu.memory_space<vmem>>, vector<8x384xbf16>,
    %c0_55 = arith.constant 0 : index
    %c111_56 = arith.constant 111 : index
    %67 = vector.load %arg8[%c0_55, %c111_56] : memref<8x640xbf16, #tpu.memory_space<vmem>>, vector<8x384xbf16>
    %c16_57 = arith.constant 16 : index
    %c0_58 = arith.constant 0 : index
    %68 = vector.load %arg10[%c16_57, %c0_58] : memref<72x384xbf16, #tpu.memory_space<vmem>>, vector<8x384xbf16>
    tpu.vector_store %arg10[%c16_57, %c0_58], %67 {strides = array<i32>} : memref<72x384xbf16, #tpu.memory_space<vmem>>, vector<8x384xbf16>,
    %c0_59 = arith.constant 0 : index
    %c127_60 = arith.constant 127 : index
    %69 = vector.load %arg8[%c0_59, %c127_60] : memref<8x640xbf16, #tpu.memory_space<vmem>>, vector<8x384xbf16>
    %c24_61 = arith.constant 24 : index
    %c0_62 = arith.constant 0 : index
    %70 = vector.load %arg10[%c24_61, %c0_62] : memref<72x384xbf16, #tpu.memory_space<vmem>>, vector<8x384xbf16>
    tpu.vector_store %arg10[%c24_61, %c0_62], %69 {strides = array<i32>} : memref<72x384xbf16, #tpu.memory_space<vmem>>, vector<8x384xbf16>,
    %c0_63 = arith.constant 0 : index
    %c128_64 = arith.constant 128 : index
    %71 = vector.load %arg8[%c0_63, %c128_64] : memref<8x640xbf16, #tpu.memory_space<vmem>>, vector<8x384xbf16>
    %c32_65 = arith.constant 32 : index
    %c0_66 = arith.constant 0 : index
    %72 = vector.load %arg10[%c32_65, %c0_66] : memref<72x384xbf16, #tpu.memory_space<vmem>>, vector<8x384xbf16>
    tpu.vector_store %arg10[%c32_65, %c0_66], %71 {strides = array<i32>} : memref<72x384xbf16, #tpu.memory_space<vmem>>, vector<8x384xbf16>,
    %c0_67 = arith.constant 0 : index
    %c129_68 = arith.constant 129 : index
    %73 = vector.load %arg8[%c0_67, %c129_68] : memref<8x640xbf16, #tpu.memory_space<vmem>>, vector<8x384xbf16>
    %c40_69 = arith.constant 40 : index
    %c0_70 = arith.constant 0 : index
    %74 = vector.load %arg10[%c40_69, %c0_70] : memref<72x384xbf16, #tpu.memory_space<vmem>>, vector<8x384xbf16>
    tpu.vector_store %arg10[%c40_69, %c0_70], %73 {strides = array<i32>} : memref<72x384xbf16, #tpu.memory_space<vmem>>, vector<8x384xbf16>,
    %c0_71 = arith.constant 0 : index
    %c145_72 = arith.constant 145 : index
    %75 = vector.load %arg8[%c0_71, %c145_72] : memref<8x640xbf16, #tpu.memory_space<vmem>>, vector<8x384xbf16>
    %c48_73 = arith.constant 48 : index
    %c0_74 = arith.constant 0 : index
    %76 = vector.load %arg10[%c48_73, %c0_74] : memref<72x384xbf16, #tpu.memory_space<vmem>>, vector<8x384xbf16>
    tpu.vector_store %arg10[%c48_73, %c0_74], %75 {strides = array<i32>} : memref<72x384xbf16, #tpu.memory_space<vmem>>, vector<8x384xbf16>,
    %c0_75 = arith.constant 0 : index
    %c146_76 = arith.constant 146 : index
    %77 = vector.load %arg8[%c0_75, %c146_76] : memref<8x640xbf16, #tpu.memory_space<vmem>>, vector<8x384xbf16>
    %c56_77 = arith.constant 56 : index
    %c0_78 = arith.constant 0 : index
    %78 = vector.load %arg10[%c56_77, %c0_78] : memref<72x384xbf16, #tpu.memory_space<vmem>>, vector<8x384xbf16>
    tpu.vector_store %arg10[%c56_77, %c0_78], %77 {strides = array<i32>} : memref<72x384xbf16, #tpu.memory_space<vmem>>, vector<8x384xbf16>,
    %c0_79 = arith.constant 0 : index
    %c147_80 = arith.constant 147 : index
    %79 = vector.load %arg8[%c0_79, %c147_80] : memref<8x640xbf16, #tpu.memory_space<vmem>>, vector<8x384xbf16>
    %c64_81 = arith.constant 64 : index
    %c0_82 = arith.constant 0 : index
    %80 = vector.load %arg10[%c64_81, %c0_82] : memref<72x384xbf16, #tpu.memory_space<vmem>>, vector<8x384xbf16>
    tpu.vector_store %arg10[%c64_81, %c0_82], %79 {strides = array<i32>} : memref<72x384xbf16, #tpu.memory_space<vmem>>, vector<8x384xbf16>,
    %c0_83 = arith.constant 0 : index
    %c0_84 = arith.constant 0 : index
    %81 = vector.load %arg4[%c0_83, %c0_84] : memref<8x72xbf16, #tpu.memory_space<vmem>>, vector<8x72xbf16>
    %c0_85 = arith.constant 0 : index
    %c0_86 = arith.constant 0 : index
    %82 = vector.load %arg10[%c0_85, %c0_86] : memref<72x384xbf16, #tpu.memory_space<vmem>>, vector<72x384xbf16>
    %cst_87 = arith.constant dense<0.000000e+00> : vector<8x384xf32>
    %83 = tpu.matmul %81, %82, %cst_87 {dimension_numbers = #tpu.dot_dimension_numbers<[1], [0], [0], [1], [0, 0, 1, 1], [], []>} : vector<8x72xbf16>, vector<72x384xbf16>, vector<8x384xf32> -> vector<8x384xf32>
    %c0_88 = arith.constant 0 : index
    %c0_89 = arith.constant 0 : index
    %84 = vector.load %arg5[%c0_88, %c0_89] : memref<8x1xf32, #tpu.memory_space<vmem>>, vector<8x1xf32>
    %85 = vector.broadcast %84 : vector<8x1xf32> to vector<8x384xf32>
    %86 = arith.addf %83, %85 : vector<8x384xf32>
    %87 = vector.broadcast %0 : vector<1x384xf32> to vector<8x384xf32>
    %88 = arith.mulf %86, %87 : vector<8x384xf32>
    %cst_90 = arith.constant dense<0.000000e+00> : vector<8xf32>
    %89 = vector.multi_reduction <add>, %88, %cst_90 [1] : vector<8x384xf32> to vector<8xf32>
    %90 = vector.shape_cast %89 : vector<8xf32> to vector<8x1xf32>
    %91 = arith.mulf %88, %88 : vector<8x384xf32>
    %cst_91 = arith.constant dense<0.000000e+00> : vector<8xf32>
    %92 = vector.multi_reduction <add>, %91, %cst_91 [1] : vector<8x384xf32> to vector<8xf32>
    %93 = vector.shape_cast %92 : vector<8xf32> to vector<8x1xf32>
    %cst_92 = arith.constant 3.906250e-03 : f32
    %94 = vector.broadcast %cst_92 : f32 to vector<8x1xf32>
    %95 = arith.mulf %90, %94 : vector<8x1xf32>
    %cst_93 = arith.constant 3.906250e-03 : f32
    %96 = vector.broadcast %cst_93 : f32 to vector<8x1xf32>
    %97 = arith.mulf %93, %96 : vector<8x1xf32>
    %98 = arith.mulf %95, %95 : vector<8x1xf32>
    %99 = arith.subf %97, %98 : vector<8x1xf32>
    %100 = vector.broadcast %95 : vector<8x1xf32> to vector<8x384xf32>
    %101 = arith.subf %86, %100 : vector<8x384xf32>
    %cst_94 = arith.constant 9.99999974E-6 : f32
    %102 = vector.broadcast %cst_94 : f32 to vector<8x1xf32>
    %103 = arith.addf %99, %102 : vector<8x1xf32>
    %104 = math.rsqrt %103 : vector<8x1xf32>
    %105 = vector.broadcast %104 : vector<8x1xf32> to vector<8x384xf32>
    %106 = arith.mulf %101, %105 : vector<8x384xf32>
    %cst_95 = arith.constant 0.000000e+00 : f32
    %107 = vector.broadcast %cst_95 : f32 to vector<8x384xf32>
    %108 = arith.maximumf %106, %107 : vector<8x384xf32>
    %c0_96 = arith.constant 0 : index
    %c0_97 = arith.constant 0 : index
    %c0_98 = arith.constant 0 : index
    %109 = vector.load %arg7[%c0_96, %c0_97, %c0_98] : memref<1x8x384xf32, #tpu.memory_space<vmem>>, vector<1x8x384xf32>
    %110 = vector.shape_cast %109 : vector<1x8x384xf32> to vector<8x384xf32>
    %111 = vector.shape_cast %108 : vector<8x384xf32> to vector<1x8x384xf32>
    tpu.vector_store %arg7[%c0_96, %c0_97, %c0_98], %111 {strides = array<i32>} : memref<1x8x384xf32, #tpu.memory_space<vmem>>, vector<1x8x384xf32>,
    return
  }
  func.func @transform_0(%arg0: i32) -> (i32, i32, i32) {
    %c0_i32 = arith.constant 0 : i32
    %c0_i32_0 = arith.constant 0 : i32
    %c0_i32_1 = arith.constant 0 : i32
    return %arg0, %c0_i32, %c0_i32_0 : i32, i32, i32
  }
  func.func @transform_1(%arg0: i32) -> (i32, i32) {
    %c0_i32 = arith.constant 0 : i32
    %c0_i32_0 = arith.constant 0 : i32
    %c0_i32_1 = arith.constant 0 : i32
    return %c0_i32, %c0_i32_0 : i32, i32
  }
  func.func @transform_2(%arg0: i32) -> (i32, i32) {
    %c0_i32 = arith.constant 0 : i32
    %c0_i32_0 = arith.constant 0 : i32
    %c0_i32_1 = arith.constant 0 : i32
    return %c0_i32, %c0_i32_0 : i32, i32
  }
  func.func @transform_3(%arg0: i32) -> (i32, i32) {
    %c0_i32 = arith.constant 0 : i32
    %c0_i32_0 = arith.constant 0 : i32
    %c0_i32_1 = arith.constant 0 : i32
    return %c0_i32, %c0_i32_0 : i32, i32
  }
  func.func @transform_4(%arg0: i32) -> (i32, i32) {
    %c0_i32 = arith.constant 0 : i32
    %c0_i32_0 = arith.constant 0 : i32
    %c0_i32_1 = arith.constant 0 : i32
    return %c0_i32, %c0_i32_0 : i32, i32
  }
  func.func @transform_5(%arg0: i32) -> (i32, i32) {
    %c0_i32 = arith.constant 0 : i32
    %c0_i32_0 = arith.constant 0 : i32
    %c0_i32_1 = arith.constant 0 : i32
    return %c0_i32, %c0_i32_0 : i32, i32
  }
  func.func @transform_6(%arg0: i32) -> (i32, i32, i32) {
    %c0_i32 = arith.constant 0 : i32
    %c0_i32_0 = arith.constant 0 : i32
    %c0_i32_1 = arith.constant 0 : i32
    return %arg0, %c0_i32, %c0_i32_0 : i32, i32, i32
  }
}

</mosaic_0001>

<bundles_post_ra>
// kernel: double_conv_forward.1
= control target key start
LH: loop header
LB: loop body
LE: loop exit
PB: predicated region body
PF: predicated region fallthrough
CT: control target
= control target key end

     0   :  { %s1256_s21 = smov 0   ;;  %s1433_s0 = inlined_call_operand.vmem [shape: bf16[2,8,640], index: 0, kind: input, shape index: {}]   ;;  %s1434_s1 = inlined_call_operand.vmem [shape: bf16[8,72], index: 1, kind: input, shape index: {}]   ;;  %s1435_s2 = inlined_call_operand.vmem [shape: f32[8,1], index: 2, kind: input, shape index: {}]   ;;  %s1436_s3 = inlined_call_operand.vmem [shape: bf16[8,72], index: 3, kind: input, shape index: {}]   ;;  %s1437_s4 = inlined_call_operand.vmem [shape: f32[8,1], index: 4, kind: input, shape index: {}]   ;;  %s1438_s5 = inlined_call_operand.vmem [shape: f32[1,384], index: 5, kind: input, shape index: {}]   ;;  %s1439_s6 = inlined_call_operand.vmem [shape: f32[2,8,384], index: 6, kind: output, shape index: {}]  }
   0x1 LB: > { %s1077_s22 = sadd.s32 4294967295, %s1208_s21   ;;  %p1081_p0 = scmp.ge.s32.totalorder %s1208_s21, 1  ;;  %s1208_s21 = sphi %s1256_s21, %s16_s21  }
   0x2   : > { %p212_p1 = scmp.lt.s32.totalorder %s1208_s21, 3 }
   0x4   : > { %p213_p2 = pnand %p1081_p0, %p212_p1 }
   0x5   : > { %p242_p3 = scmp.lt.s32.totalorder (!%p213_p2), %s1077_s22, 1  ;;  %s1210_s27 = smov (!%p213_p2), 109  }
   0x6   : > { %216 = sbr.rel (%p213_p2) target bundleno = 1066 (0x42a), region = 44  ;;  %s1211_s28 = smov (!%p213_p2), 111  }
   0x7   : > { %s1213_s29 = smov (!%p213_p2), 110   ;;  %s1214_s30 = smov (!%p213_p2), 127  }
   0x8   : > { %s1215_s7 = smov (!%p213_p2), 17   ;;  %s1216_s8 = smov (!%p213_p2), 1  }
   0x9   : > { %s1217_s9 = smov (!%p213_p2), 19   ;;  %s1219_s10 = smov (!%p213_p2), 18  }
   0xb   : > { %s1441_s22 = smov (!%p242_p3, %s1077_s22), 1  ;;  %v1212_v3 = vmov 0.0   ;;  %v1218_v6 = vmov 0   ;;  %vm1220_vm0 = vmmov 0   ;;  %v424_v7 = vld [vmem:[%s1435_s2] sm:$0xff]  ;;  %vm266_vm1 = vcmask 1043456  }
   0xc   : > { %s1166_s23 = smul.u32 20, %s1441_s22  ;;  %1138 = vmatprep.subr.bf16.mxu1 %v1212_v3  ;;  %254 = vst [vmem:[#allocation2] sm:$0xf] %v1218_v6  ;;  %255 = vst [vmem:[#allocation2 + $0x10] sm:$0xf] %v1218_v6  ;;  %548 = vmatprep.mubr.bf16.mxu0 %v1218_v6  ;;  %vm398_vm2 = vcmask 891904  }
   0xd   : > { %1187 = vset.pattern.permute.xlu0 %v1218_v6  ;;  %1148 = vmatprep.mubr.msk.bf16.mxu1 %vm1220_vm0, %v1212_v3  ;;  %vm362_vm3 = vcmask 908288   ;;  %vm380_vm4 = vcmask 900096   ;;  %vm344_vm5 = vcmask 1039360   ;;  %vm304_vm6 = vcmask 138240  }
   0xe   : > { %s246_s26 = scalar_lea.vmem %s1433_s0, %s1166_s23  ;;  %vm322_vm7 = vcmask 7168   ;;  %vm268_vm8 = vcmask 154624   ;;  %vm286_vm9 = vcmask 146432   ;;  %vm502_vm10 = vcmask 588800   ;;  %s1167_s23 = smul.u32 24, %s1441_s22 }
   0xf   : > { %v1270_v0 = vld [vmem:[%s246_s26 + $0x4] sm:$0xff]  ;;  %v388_v1 = vld [vmem:[%s246_s26 + $0xc] sm:$0xff] }
  0x10   : > { %391 = vrot.lane.b32.xlu0 %v1270_v0, %s1210_s27  ;;  %355 = vrot.lane.b32.xlu1 %v1270_v0, %s1211_s28  ;;  %v330_v2 = vld [vmem:[%s246_s26 + $0xc] sm:$0xf]  ;;  %v293_v5 = vld [vmem:[%s246_s26] sm:$0xff] }
  0x11   : > { %332 = vst [vmem:[#allocation3 + $0x38] sm:$0xf] %v330_v2  ;;  %v294_v4 = vld [vmem:[%s246_s26 + $0x8] sm:$0xff]  ;;  %s251_s26 = scalar_lea.vmem %s1439_s6, %s1167_s23 }
  0x14   : > { %393 = vrot.lane.b32.xlu0 %v388_v1, %s1210_s27  ;;  %357 = vrot.lane.b32.xlu1 %v388_v1, %s1211_s28 }
  0x18   : > { %373 = vrot.lane.b32.xlu0 %v1270_v0, %s1213_s29  ;;  %375 = vrot.lane.b32.xlu1 %v388_v1, %s1213_s29 }
  0x1c   : > { %339 = vrot.lane.b32.xlu1 %v388_v1, %s1214_s30  ;;  %337 = vrot.lane.b32.xlu0 %v1270_v0, %s1214_s30 }
  0x20   : > { %299 = vrot.lane.b32.xlu1 %v294_v4, %s1215_s7  ;;  %297 = vrot.lane.b32.xlu0 %v293_v5, %s1215_s7 }
  0x24   : > { %317 = vrot.lane.b32.xlu1 %v294_v4, %s1216_s8  ;;  %315 = vrot.lane.b32.xlu0 %v293_v5, %s1216_s8 }
  0x28   : > { %262 = vrot.lane.b32.xlu1 %v294_v4, %s1217_s9  ;;  %260 = vrot.lane.b32.xlu0 %v293_v5, %s1217_s9 }
  0x2c   : > { %281 = vrot.lane.b32.xlu1 %v294_v4, %s1219_s10  ;;  %279 = vrot.lane.b32.xlu0 %v293_v5, %s1219_s10 }
  0x30   : > { %427 = vperm.xlu0 %1187, %v424_v7  }
  0x82   : > { %v392_v8 = vpop.permute.xlu0 %391  ;;  %v356_v9 = vpop.permute.xlu1 %355 }
  0x83   : > { %v395_v12 = vrot.slane %v392_v8, 4  ;;  %v359_v13 = vrot.slane %v356_v9, 4 }
  0x86   : > { %v394_v10 = vpop.permute.xlu0 %393  ;;  %v358_v11 = vpop.permute.xlu1 %357 }
  0x87   : > { %v396_v14 = vrot.slane %v394_v10, 4  ;;  %v360_v15 = vrot.slane %v358_v11, 4 }
  0x89   : > { %v397_v16 = vsel %vm266_vm1, %v395_v12, %v396_v14  ;;  %v400_v17 = vsel %vm398_vm2, %v394_v10, %v396_v14  ;;  %v361_v18 = vsel %vm266_vm1, %v359_v13, %v360_v15  ;;  %v364_v19 = vsel %vm362_vm3, %v358_v11, %v360_v15 }
  0x8a   : > { %v399_v20 = vsel %vm398_vm2, %v392_v8, %v397_v16  ;;  %404 = vst [vmem:[#allocation3 + $0x68] sm:$0xf] %v400_v17  ;;  %v363_v21 = vsel %vm362_vm3, %v356_v9, %v361_v18  ;;  %368 = vst [vmem:[#allocation3 + $0x50] sm:$0xf] %v364_v19  ;;  %v374_v22 = vpop.permute.xlu0 %373  ;;  %v376_v23 = vpop.permute.xlu1 %375  ;;  %v405_v18 = vld [vmem:[%s1434_s1] sm:$0xf] }
  0x8b   : > { %v377_v24 = vrot.slane %v374_v22, 4  ;;  %v378_v25 = vrot.slane %v376_v23, 4  ;;  %v1097_v26 = vcombine.high %v399_v20, %v399_v20  ;;  %v1096_v27 = vcombine.low %v399_v20, %v399_v20 }
  0x8c   : > { %v598_v20 = vlaneseq }
  0x8d   : > { %v379_v28 = vsel %vm266_vm1, %v377_v24, %v378_v25  ;;  %v382_v29 = vsel %vm380_vm4, %v376_v23, %v378_v25  ;;  %1099 = vmatprep.subr.msk.bf16.mxu0 %vm266_vm1, %v1097_v26  ;;  %v508_v30 = vsel %vm266_vm1, %v1096_v27, 0  ;;  %v253_v23 = vld [vmem:[%s1438_s5] sm:$0x7] }
  0x8e   : > { %v381_v31 = vsel %vm380_vm4, %v374_v22, %v379_v28  ;;  %386 = vst [vmem:[#allocation3 + $0x5c] sm:$0xf] %v382_v29  ;;  %v340_v32 = vpop.permute.xlu1 %339  ;;  %v338_v33 = vpop.permute.xlu0 %337  ;;  %523 = vmatpush1.bf16.msra.mxu0 %v508_v30 }
  0x8f   : > { %v342_v34 = vrot.slane %v340_v32, 4  ;;  %v341_v35 = vrot.slane %v338_v33, 4  ;;  %v1094_v36 = vcombine.high %v363_v21, %v381_v31  ;;  %v1093_v37 = vcombine.low %v363_v21, %v381_v31 }
  0x90   : > { %v599_v21 = vshrl.u32 %v598_v20, 7 }
  0x91   : > { %v346_v38 = vsel %vm344_vm5, %v340_v32, %v342_v34  ;;  %v343_v39 = vsel %vm266_vm1, %v341_v35, %v342_v34  ;;  %v1188_v40 = vld [vmem:[#allocation3 + $0x68] ss:$0 sps:$4 sm:$0xff]   ;;  %524 = vmatprep.subr.bf16.mxu0 %v1094_v36 }
  0x92   : > { %350 = vst [vmem:[#allocation3 + $0x44] sm:$0xf] %v346_v38  ;;  %v345_v41 = vsel %vm344_vm5, %v338_v33, %v343_v39  ;;  %v300_v42 = vpop.permute.xlu1 %299  ;;  %v298_v43 = vpop.permute.xlu0 %297  ;;  %525 = vmatpush1.bf16.msra.mxu0 %v1093_v37  ;;  %v514_v46 = vsel %vm266_vm1, %v1188_v40, 0  ;;  %v600_v22 = vsub.s32 0, %v599_v21  ;;  %v604_v24 = vsub.s32 1, %v599_v21 }
  0x93   : > { %v302_v44 = vrot.slane %v300_v42, 4  ;;  %v301_v45 = vrot.slane %v298_v43, 4  ;;  %v1091_v47 = vcombine.high %v1270_v0, %v345_v41  ;;  %1139 = vmatpush3.bf16.msra.mxu1 %v514_v46  ;;  %v1090_v48 = vcombine.low %v1270_v0, %v345_v41 }
  0x94   : > { %1140 = vmatprep.subr.bf16.mxu1 %v1212_v3  ;;  %v1347_v26 = vrot.slane %v253_v23, %v600_v22  ;;  %v608_v27 = vsub.s32 2, %v599_v21  ;;  %v1349_v29 = vrot.slane %v253_v23, %v604_v24 }
  0x95   : > { %v306_v49 = vsel %vm304_vm6, %v300_v42, %v302_v44  ;;  %v303_v50 = vsel %vm266_vm1, %v301_v45, %v302_v44  ;;  %v1189_v51 = vld [vmem:[#allocation3 + $0x50] ss:$12 sps:$4 sm:$0xff]   ;;  %526 = vmatprep.subr.bf16.mxu0 %v1091_v47 }
  0x96   : > { %310 = vst [vmem:[#allocation3 + $0x20] sm:$0xf] %v306_v49  ;;  %v305_v52 = vsel %vm304_vm6, %v298_v43, %v303_v50  ;;  %v318_v53 = vpop.permute.xlu1 %317  ;;  %v316_v54 = vpop.permute.xlu0 %315  ;;  %527 = vmatpush1.bf16.msra.mxu0 %v1090_v48  ;;  %v1352_v34 = vrot.slane %v253_v23, %v608_v27 }
  0x97   : > { %v320_v55 = vrot.slane %v318_v53, 4  ;;  %v319_v56 = vrot.slane %v316_v54, 4  ;;  %1141 = vmatpush3.bf16.msra.mxu1 %v1189_v51 }
  0x98   : > { %1142 = vmatprep.subr.bf16.mxu1 %v1212_v3 }
  0x99   : > { %v324_v57 = vsel %vm322_vm7, %v318_v53, %v320_v55  ;;  %v321_v58 = vsel %vm266_vm1, %v319_v56, %v320_v55  ;;  %v1190_v59 = vld [vmem:[#allocation3 + $0x38] ss:$12 sps:$4 sm:$0xff]  }
  0x9a   : > { %328 = vst [vmem:[#allocation3 + $0x2c] sm:$0xf] %v324_v57  ;;  %v323_v60 = vsel %vm322_vm7, %v316_v54, %v321_v58  ;;  %v263_v61 = vpop.permute.xlu1 %262  ;;  %v261_v62 = vpop.permute.xlu0 %260 }
  0x9b   : > { %v265_v63 = vrot.slane %v263_v61, 4  ;;  %v264_v0 = vrot.slane %v261_v62, 4  ;;  %v1088_v1 = vcombine.high %v305_v52, %v323_v60  ;;  %v1087_v2 = vcombine.low %v305_v52, %v323_v60  ;;  %1143 = vmatpush3.bf16.msra.mxu1 %v1190_v59 }
  0x9c   : > { %1144 = vmatprep.subr.bf16.mxu1 %v1212_v3 }
  0x9d   : > { %v270_v4 = vsel %vm268_vm8, %v263_v61, %v265_v63  ;;  %v267_v5 = vsel %vm266_vm1, %v264_v0, %v265_v63  ;;  %528 = vmatprep.subr.bf16.mxu0 %v1088_v1 }
  0x9e   : > { %274 = vst [vmem:[#allocation3 + $0x8] sm:$0xf] %v270_v4  ;;  %v269_v7 = vsel %vm268_vm8, %v261_v62, %v267_v5  ;;  %v282_v8 = vpop.permute.xlu1 %281  ;;  %v280_v9 = vpop.permute.xlu0 %279  ;;  %529 = vmatpush1.bf16.msra.mxu0 %v1087_v2 }
  0x9f   : > { %v284_v10 = vrot.slane %v282_v8, 4  ;;  %v283_v11 = vrot.slane %v280_v9, 4 }
  0xa1   : > { %v288_v12 = vsel %vm286_vm9, %v282_v8, %v284_v10  ;;  %v285_v13 = vsel %vm266_vm1, %v283_v11, %v284_v10  ;;  %v1191_v14 = vld [vmem:[#allocation3 + $0x20] ss:$12 sps:$4 sm:$0xff]  }
  0xa2   : > { %292 = vst [vmem:[#allocation3 + $0x14] sm:$0xf] %v288_v12  ;;  %v287_v15 = vsel %vm286_vm9, %v280_v9, %v285_v13  ;;  %1145 = vmatpush3.bf16.msra.mxu1 %v1191_v14  ;;  %v819_v14 = vld [vmem:[%s1437_s4] sm:$0xff] }
  0xa3   : > { %v1085_v16 = vcombine.high %v269_v7, %v287_v15  ;;  %v1084_v17 = vcombine.low %v269_v7, %v287_v15  ;;  %1146 = vmatprep.subr.bf16.mxu1 %v1212_v3 }
  0xa5   : > { %530 = vmatprep.subr.bf16.mxu0 %v1085_v16 }
  0xa6   : > { %531 = vmatpush1.bf16.msra.mxu0 %v1084_v17 }
  0xa9   : > { %v1192_v19 = vld [vmem:[#allocation3 + $0x8] ss:$12 sps:$4 sm:$0xff]   ;;  %1100 = vmatmul.mubr.msk.bf16.vlgmr.msra.gmra.mxu0 %vm502_vm10, %v405_v18 }
  0xaa   : > { %941 = vmatprep.mubr.bf16.mxu0 %v1218_v6  ;;  %1147 = vmatpush3.bf16.msra.mxu1 %v1192_v19 }
  0xab   : > { %1152 = vmatprep.subr.bf16.mxu1 %v1212_v3  ;;  %v428_v25 = vpop.permute.xlu0 %427 }
  0xad   : > { %1149 = vmatmul.mubr.msk.bf16.vlgmr.msra.gmra.mxu1 %vm502_vm10, %v405_v18 }
  0xae   : > { %1162 = vmatprep.mubr.msk.bf16.mxu1 %vm1220_vm0, %v1212_v3 }
 0x169   : > { %v550_v6 = vpop.f32.mrf.mxu0 }
 0x16a   : > { %v551_v28 = vadd.f32 %v550_v6, %v428_v25 }
 0x16b   : > { %v552_v30 = vpop.f32.mrf.mxu0 }
 0x16c   : > { %v553_v31 = vadd.f32 %v552_v30, %v428_v25  ;;  %v613_v32 = vmul.f32 %v1347_v26, %v551_v28 }
 0x16d   : > { %v554_v33 = vpop.f32.mrf.mxu0  ;;  %v591_v35 = vpop.f32.mrf.mxu1 }
 0x16e   : > { %v614_v36 = vmul.f32 %v1349_v29, %v553_v31  ;;  %v620_v37 = vmul.f32 %v613_v32, %v613_v32  ;;  %v592_v38 = vadd.f32 %v591_v35, %v428_v25 }
 0x16f   : > { %v555_v39 = vpop.f32.mrf.mxu0  ;;  %v1150_v40 = vpop.f32.mrf.mxu1 }
 0x170   : > { %v621_v41 = vmul.f32 %v614_v36, %v614_v36  ;;  %v616_v42 = vadd.f32 %v614_v36, %v613_v32  ;;  %v615_v43 = vmul.f32 %v1352_v34, %v592_v38 }
 0x171   : > { %v594_v44 = vpop.f32.mrf.mxu1 }
 0x172   : > { %v623_v45 = vadd.f32 %v621_v41, %v620_v37  ;;  %v617_v46 = vadd.f32 %v616_v42, %v615_v43  ;;  %v622_v47 = vmul.f32 %v615_v43, %v615_v43 }
 0x173   : > { %v1151_v48 = vpop.f32.mrf.mxu1 }
 0x174   : > { %618 = vadd.xlane.f32.xlu1 %v617_v46  ;;  %v624_v49 = vadd.f32 %v623_v45, %v622_v47 }
 0x176   : > { %625 = vadd.xlane.f32.xlu0 %v624_v49 }
 0x1fd   : > { %v619_v50 = vpop.xlane.xlu1 %618 }
 0x1fe   : > { %v627_v51 = vmul.f32 0.00390625, %v619_v50 }
 0x1ff   : > { %v626_v52 = vpop.xlane.xlu0 %625 }
 0x200   : > { %v628_v53 = vmul.f32 0.00390625, %v626_v52  ;;  %v629_v54 = vmul.f32 %v627_v51, %v627_v51  ;;  %v631_v57 = vsub.f32 %v551_v28, %v627_v51  ;;  %v632_v58 = vsub.f32 %v553_v31, %v627_v51 }
 0x201   : > { %v633_v59 = vsub.f32 %v592_v38, %v627_v51 }
 0x202   : > { %v630_v55 = vsub.f32 %v628_v53, %v629_v54 }
 0x204   : > { %v634_v56 = vadd.f32 1e-05, %v630_v55 }
 0x206   : > { %1198 = vrsqrt.f32 %v634_v56 }
 0x213   : > { %v1199_v60 = vpop.eup %1198 }
 0x214   : > { %v636_v61 = vmul.f32 %v1199_v60, %v631_v57  ;;  %v637_v62 = vmul.f32 %v1199_v60, %v632_v58  ;;  %v638_v63 = vmul.f32 %v1199_v60, %v633_v59 }
 0x216   : > { %v639_v0 = vmax.f32 %v636_v61, 0.0  ;;  %v640_v1 = vmax.f32 %v637_v62, 0.0  ;;  %v641_v2 = vmax.f32 %v638_v63, 0.0 }
 0x218   : > { %v644_v4 = vmul.f32 %v641_v2, %v1352_v34  ;;  %v642_v5 = vmul.f32 %v639_v0, %v1347_v26  ;;  %v643_v7 = vmul.f32 %v640_v1, %v1349_v29 }
 0x21a   : > { %v1125_v8 = vpack.c.bf16 %v644_v4, %v644_v4  ;;  %v1359_v9 = vpack.c.bf16 %v643_v7, %v642_v5 }
 0x21c   : > { %659 = vst [vmem:[#allocation2 + $0xc] sm:$0xf] %v1125_v8  ;;  %658 = vst [vmem:[#allocation2 + $0x4] sm:$0xff] %v1359_v9  ;;  %787 = vrot.lane.b32.xlu1 %v1359_v9, %s1210_s27 }
 0x220   : > { %753 = vrot.lane.b32.xlu1 %v1359_v9, %s1211_s28 }
 0x223   : > { %v784_v10 = vld [vmem:[#allocation2 + $0xc] sm:$0xff]  ;;  %v694_v12 = vld [vmem:[#allocation2] sm:$0xff] }
 0x224   : > { %789 = vrot.lane.b32.xlu0 %v784_v10, %s1210_s27  ;;  %755 = vrot.lane.b32.xlu1 %v784_v10, %s1211_s28  ;;  %v729_v11 = vld [vmem:[#allocation2 + $0xc] sm:$0xf] }
 0x225   : > { %731 = vst [vmem:[#allocation4 + $0x38] sm:$0xf] %v729_v11  ;;  %v695_v13 = vld [vmem:[#allocation2 + $0x8] sm:$0xff] }
 0x228   : > { %770 = vrot.lane.b32.xlu0 %v1359_v9, %s1213_s29  ;;  %772 = vrot.lane.b32.xlu1 %v784_v10, %s1213_s29 }
 0x22c   : > { %736 = vrot.lane.b32.xlu0 %v1359_v9, %s1214_s30  ;;  %738 = vrot.lane.b32.xlu1 %v784_v10, %s1214_s30 }
 0x230   : > { %698 = vrot.lane.b32.xlu0 %v694_v12, %s1215_s7  ;;  %700 = vrot.lane.b32.xlu1 %v695_v13, %s1215_s7 }
 0x234   : > { %715 = vrot.lane.b32.xlu0 %v694_v12, %s1216_s8  ;;  %717 = vrot.lane.b32.xlu1 %v695_v13, %s1216_s8 }
 0x238   : > { %664 = vrot.lane.b32.xlu0 %v694_v12, %s1217_s9  ;;  %666 = vrot.lane.b32.xlu1 %v695_v13, %s1217_s9 }
 0x23c   : > { %681 = vrot.lane.b32.xlu0 %v694_v12, %s1219_s10  ;;  %683 = vrot.lane.b32.xlu1 %v695_v13, %s1219_s10 }
 0x240   : > { %822 = vperm.xlu0 %1187, %v819_v14  }
 0x28e   : > { %v788_v15 = vpop.permute.xlu1 %787 }
 0x28f   : > { %v791_v20 = vrot.slane %v788_v15, 4 }
 0x292   : > { %v754_v16 = vpop.permute.xlu1 %753 }
 0x293   : > { %v757_v21 = vrot.slane %v754_v16, 4 }
 0x296   : > { %v790_v17 = vpop.permute.xlu0 %789  ;;  %v756_v18 = vpop.permute.xlu1 %755 }
 0x297   : > { %v792_v19 = vrot.slane %v790_v17, 4  ;;  %v758_v22 = vrot.slane %v756_v18, 4 }
 0x299   : > { %v795_v23 = vsel %vm398_vm2, %v790_v17, %v792_v19  ;;  %v793_v24 = vsel %vm266_vm1, %v791_v20, %v792_v19  ;;  %v759_v25 = vsel %vm266_vm1, %v757_v21, %v758_v22  ;;  %v761_v6 = vsel %vm362_vm3, %v756_v18, %v758_v22 }
 0x29a   : > { %799 = vst [vmem:[#allocation4 + $0x68] sm:$0xf] %v795_v23  ;;  %v794_v27 = vsel %vm398_vm2, %v788_v15, %v793_v24  ;;  %v771_v28 = vpop.permute.xlu0 %770  ;;  %v760_v30 = vsel %vm362_vm3, %v754_v16, %v759_v25  ;;  %765 = vst [vmem:[#allocation4 + $0x50] sm:$0xf] %v761_v6  ;;  %v773_v31 = vpop.permute.xlu1 %772 }
 0x29b   : > { %v774_v32 = vrot.slane %v771_v28, 4  ;;  %v775_v33 = vrot.slane %v773_v31, 4  ;;  %v1117_v35 = vcombine.high %v794_v27, %v794_v27  ;;  %v1116_v36 = vcombine.low %v794_v27, %v794_v27  ;;  %v800_v27 = vld [vmem:[%s1436_s3] sm:$0xf] }
 0x29d   : > { %v776_v37 = vsel %vm266_vm1, %v774_v32, %v775_v33  ;;  %v778_v38 = vsel %vm380_vm4, %v773_v31, %v775_v33  ;;  %1119 = vmatprep.subr.msk.bf16.mxu0 %vm266_vm1, %v1117_v35  ;;  %v901_v39 = vsel %vm266_vm1, %v1116_v36, 0 }
 0x29e   : > { %v737_v40 = vpop.permute.xlu0 %736  ;;  %v777_v41 = vsel %vm380_vm4, %v771_v28, %v776_v37  ;;  %782 = vst [vmem:[#allocation4 + $0x5c] sm:$0xf] %v778_v38  ;;  %916 = vmatpush1.bf16.msra.mxu0 %v901_v39  ;;  %v739_v42 = vpop.permute.xlu1 %738 }
 0x29f   : > { %v740_v43 = vrot.slane %v737_v40, 4  ;;  %v741_v44 = vrot.slane %v739_v42, 4  ;;  %v1113_v45 = vcombine.low %v760_v30, %v777_v41  ;;  %v1114_v46 = vcombine.high %v760_v30, %v777_v41 }
 0x2a1   : > { %v1193_v47 = vld [vmem:[#allocation4 + $0x68] ss:$0 sps:$4 sm:$0xff]   ;;  %v742_v48 = vsel %vm266_vm1, %v740_v43, %v741_v44  ;;  %v744_v49 = vsel %vm344_vm5, %v739_v42, %v741_v44  ;;  %917 = vmatprep.subr.bf16.mxu0 %v1114_v46 }
 0x2a2   : > { %v699_v50 = vpop.permute.xlu0 %698  ;;  %v743_v51 = vsel %vm344_vm5, %v737_v40, %v742_v48  ;;  %748 = vst [vmem:[#allocation4 + $0x44] sm:$0xf] %v744_v49  ;;  %v701_v52 = vpop.permute.xlu1 %700  ;;  %918 = vmatpush1.bf16.msra.mxu0 %v1113_v45  ;;  %v907_v54 = vsel %vm266_vm1, %v1193_v47, 0 }
 0x2a3   : > { %v702_v53 = vrot.slane %v699_v50, 4  ;;  %v703_v55 = vrot.slane %v701_v52, 4  ;;  %v1110_v56 = vcombine.low %v1359_v9, %v743_v51  ;;  %1153 = vmatpush3.bf16.msra.mxu1 %v907_v54  ;;  %v1111_v57 = vcombine.high %v1359_v9, %v743_v51 }
 0x2a4   : > { %1154 = vmatprep.subr.bf16.mxu1 %v1212_v3 }
 0x2a5   : > { %v704_v58 = vsel %vm266_vm1, %v702_v53, %v703_v55  ;;  %v706_v59 = vsel %vm304_vm6, %v701_v52, %v703_v55  ;;  %v1194_v60 = vld [vmem:[#allocation4 + $0x50] ss:$12 sps:$4 sm:$0xff]   ;;  %919 = vmatprep.subr.bf16.mxu0 %v1111_v57 }
 0x2a6   : > { %v716_v61 = vpop.permute.xlu0 %715  ;;  %v705_v62 = vsel %vm304_vm6, %v699_v50, %v704_v58  ;;  %710 = vst [vmem:[#allocation4 + $0x20] sm:$0xf] %v706_v59  ;;  %v718_v63 = vpop.permute.xlu1 %717  ;;  %920 = vmatpush1.bf16.msra.mxu0 %v1110_v56 }
 0x2a7   : > { %v719_v0 = vrot.slane %v716_v61, 4  ;;  %v720_v1 = vrot.slane %v718_v63, 4  ;;  %1155 = vmatpush3.bf16.msra.mxu1 %v1194_v60 }
 0x2a8   : > { %1156 = vmatprep.subr.bf16.mxu1 %v1212_v3 }
 0x2a9   : > { %v721_v2 = vsel %vm266_vm1, %v719_v0, %v720_v1  ;;  %v723_v4 = vsel %vm322_vm7, %v718_v63, %v720_v1  ;;  %v1195_v5 = vld [vmem:[#allocation4 + $0x38] ss:$12 sps:$4 sm:$0xff]  }
 0x2aa   : > { %v665_v7 = vpop.permute.xlu0 %664  ;;  %v722_v8 = vsel %vm322_vm7, %v716_v61, %v721_v2  ;;  %727 = vst [vmem:[#allocation4 + $0x2c] sm:$0xf] %v723_v4  ;;  %v667_v9 = vpop.permute.xlu1 %666 }
 0x2ab   : > { %v668_v10 = vrot.slane %v665_v7, 4  ;;  %v669_v11 = vrot.slane %v667_v9, 4  ;;  %v1107_v12 = vcombine.low %v705_v62, %v722_v8  ;;  %v1108_v13 = vcombine.high %v705_v62, %v722_v8  ;;  %1157 = vmatpush3.bf16.msra.mxu1 %v1195_v5 }
 0x2ac   : > { %1158 = vmatprep.subr.bf16.mxu1 %v1212_v3 }
 0x2ad   : > { %v670_v14 = vsel %vm266_vm1, %v668_v10, %v669_v11  ;;  %v672_v15 = vsel %vm268_vm8, %v667_v9, %v669_v11  ;;  %921 = vmatprep.subr.bf16.mxu0 %v1108_v13 }
 0x2ae   : > { %v682_v16 = vpop.permute.xlu0 %681  ;;  %v671_v17 = vsel %vm268_vm8, %v665_v7, %v670_v14  ;;  %676 = vst [vmem:[#allocation4 + $0x8] sm:$0xf] %v672_v15  ;;  %v684_v18 = vpop.permute.xlu1 %683  ;;  %922 = vmatpush1.bf16.msra.mxu0 %v1107_v12 }
 0x2af   : > { %v685_v19 = vrot.slane %v682_v16, 4  ;;  %v686_v20 = vrot.slane %v684_v18, 4 }
 0x2b1   : > { %v687_v21 = vsel %vm266_vm1, %v685_v19, %v686_v20  ;;  %v689_v22 = vsel %vm286_vm9, %v684_v18, %v686_v20  ;;  %v1196_v23 = vld [vmem:[#allocation4 + $0x20] ss:$12 sps:$4 sm:$0xff]  }
 0x2b2   : > { %v688_v24 = vsel %vm286_vm9, %v682_v16, %v687_v21  ;;  %693 = vst [vmem:[#allocation4 + $0x14] sm:$0xf] %v689_v22  ;;  %1159 = vmatpush3.bf16.msra.mxu1 %v1196_v23 }
 0x2b3   : > { %v1104_v25 = vcombine.low %v671_v17, %v688_v24  ;;  %v1105_v6 = vcombine.high %v671_v17, %v688_v24  ;;  %1160 = vmatprep.subr.bf16.mxu1 %v1212_v3 }
 0x2b5   : > { %923 = vmatprep.subr.bf16.mxu0 %v1105_v6 }
 0x2b6   : > { %924 = vmatpush1.bf16.msra.mxu0 %v1104_v25 }
 0x2b9   : > { %v1197_v28 = vld [vmem:[#allocation4 + $0x8] ss:$12 sps:$4 sm:$0xff]   ;;  %1120 = vmatmul.mubr.msk.bf16.vlgmr.msra.gmra.mxu0 %vm502_vm10, %v800_v27 }
 0x2ba   : > { %1161 = vmatpush3.bf16.msra.mxu1 %v1197_v28 }
 0x2bb   : > { %v823_v30 = vpop.permute.xlu0 %822 }
 0x2bd   : > { %1163 = vmatmul.mubr.msk.bf16.vlgmr.msra.gmra.mxu1 %vm502_vm10, %v800_v27 }
 0x379   : > { %v943_v31 = vpop.f32.mrf.mxu0 }
 0x37a   : > { %v944_v32 = vadd.f32 %v943_v31, %v823_v30 }
 0x37b   : > { %v945_v33 = vpop.f32.mrf.mxu0 }
 0x37c   : > { %v990_v35 = vmul.f32 %v944_v32, %v1347_v26  ;;  %v946_v36 = vadd.f32 %v945_v33, %v823_v30 }
 0x37d   : > { %v947_v3 = vpop.f32.mrf.mxu0  ;;  %v984_v37 = vpop.f32.mrf.mxu1 }
 0x37e   : > { %v991_v38 = vmul.f32 %v946_v36, %v1349_v29  ;;  %v985_v39 = vadd.f32 %v984_v37, %v823_v30  ;;  %v997_v41 = vmul.f32 %v990_v35, %v990_v35 }
 0x37f   : > { %v948_v40 = vpop.f32.mrf.mxu0  ;;  %v1164_v42 = vpop.f32.mrf.mxu1 }
 0x380   : > { %v998_v43 = vmul.f32 %v991_v38, %v991_v38  ;;  %v993_v44 = vadd.f32 %v991_v38, %v990_v35  ;;  %v992_v45 = vmul.f32 %v985_v39, %v1352_v34 }
 0x381   : > { %v987_v46 = vpop.f32.mrf.mxu1 }
 0x382   : > { %v1000_v47 = vadd.f32 %v998_v43, %v997_v41  ;;  %v994_v48 = vadd.f32 %v993_v44, %v992_v45  ;;  %v999_v49 = vmul.f32 %v992_v45, %v992_v45 }
 0x383   : > { %v1165_v50 = vpop.f32.mrf.mxu1 }
 0x384   : > { %995 = vadd.xlane.f32.xlu1 %v994_v48  ;;  %v1001_v26 = vadd.f32 %v1000_v47, %v999_v49 }
 0x386   : > { %1002 = vadd.xlane.f32.xlu0 %v1001_v26 }
 0x40d   : > { %v996_v51 = vpop.xlane.xlu1 %995 }
 0x40e   : > { %v1004_v52 = vmul.f32 0.00390625, %v996_v51 }
 0x40f   : > { %v1003_v29 = vpop.xlane.xlu0 %1002 }
 0x410   : > { %v1005_v53 = vmul.f32 0.00390625, %v1003_v29  ;;  %v1006_v54 = vmul.f32 %v1004_v52, %v1004_v52  ;;  %v1008_v57 = vsub.f32 %v944_v32, %v1004_v52  ;;  %v1009_v34 = vsub.f32 %v946_v36, %v1004_v52 }
 0x411   : > { %v1010_v58 = vsub.f32 %v985_v39, %v1004_v52 }
 0x412   : > { %v1007_v55 = vsub.f32 %v1005_v53, %v1006_v54 }
 0x414   : > { %v1011_v56 = vadd.f32 1e-05, %v1007_v55 }
 0x416   : > { %1200 = vrsqrt.f32 %v1011_v56 }
 0x423   : > { %v1201_v59 = vpop.eup %1200 }
 0x424   : > { %v1013_v60 = vmul.f32 %v1201_v59, %v1008_v57  ;;  %v1014_v61 = vmul.f32 %v1201_v59, %v1009_v34  ;;  %v1015_v62 = vmul.f32 %v1201_v59, %v1010_v58 }
 0x426   : > { %v1016_v63 = vmax.f32 %v1013_v60, 0.0  ;;  %v1017_v0 = vmax.f32 %v1014_v61, 0.0  ;;  %v1018_v1 = vmax.f32 %v1015_v62, 0.0 }
 0x428   : > { %1019 = vst [vmem:[%s251_s26] sm:$0xff] %v1016_v63  ;;  %1020 = vst [vmem:[%s251_s26 + $0x8] sm:$0xff] %v1017_v0 }
 0x429   : > { %1021 = vst [vmem:[%s251_s26 + $0x10] sm:$0xff] %v1018_v1 }
 0x42a PF: > { %s16_s21 = sadd.s32 1, %s1208_s21  }
 0x42b   : > { %p13_p4 = scmp.ge.s32.totalorder %s16_s21, 4  }
 0x42d   :  { %15 = sbr.rel (!%p13_p4) target bundleno = 1 (0x1), region = 74 }

</bundles_post_ra>
